<compile_context>
chip_gen: v5e
topology: v5e:2x2
jax: 0.10.0
libtpu: 0.0.40
codegen_flags: <defaults>
</compile_context>

<pallas_src>
import functools
import math

import jax
import jax.numpy as jnp
from jax import lax
from jax.experimental import pallas as pl
from jax.experimental.pallas import tpu as pltpu


@functools.lru_cache(maxsize=1)
def _vmem_limit_bytes():
    """Generation-aware scoped-VMEM budget (v5e/v6e: 128 MiB phys, v7x: 64 MiB)."""
    cap = 128 * 1024 * 1024
    try:
        cap = int(getattr(pltpu.get_tpu_info(), "vmem_capacity_bytes", cap))
    except Exception:  # interpret mode / unknown platform: keep default
        pass
    return 100 * 1024 * 1024 if cap >= 128 * 1024 * 1024 else 40 * 1024 * 1024


def _choose_block(total, preferred=(512, 256, 128, 64, 32, 16, 8)):
    """Largest preferred tile dividing `total` (keeps (8,128)-legal blocks);
    falls back to the full extent (full-dim blocks are always legal)."""
    for cand in preferred:
        if cand <= total and total % cand == 0:
            return cand
    return total


def _compiler_params(sem):
    return pltpu.CompilerParams(
        dimension_semantics=sem, vmem_limit_bytes=_vmem_limit_bytes())


# ---------------------------------------------------------------------------
# Kernel 1: dense linear layer  out = x @ W + b   (tiled over rows)
# ---------------------------------------------------------------------------
def _linear_kernel(x_ref, w_ref, b_ref, o_ref):
    x = x_ref[...].astype(jnp.bfloat16)                # bf16 MXU operand (no-op if bf16)
    acc = jnp.dot(x, w_ref[...], preferred_element_type=jnp.float32)
    o_ref[...] = (acc + b_ref[...]).astype(o_ref.dtype)


def pallas_linear(x2d, w_bf16, b, *, out_dtype=jnp.bfloat16):
    """x2d: (M, Din), w_bf16: (Din, Dout) bf16, b: (Dout,) f32 -> (M, Dout) out_dtype."""
    M, Din = x2d.shape
    Dout = w_bf16.shape[1]
    tm = _choose_block(M)                              # prefer 512-row tiles (HBM roofline)
    return pl.pallas_call(
        _linear_kernel,
        out_shape=jax.ShapeDtypeStruct((M, Dout), out_dtype),
        grid=(M // tm,),
        in_specs=[
            pl.BlockSpec((tm, Din), lambda i: (i, 0)),     # row tile, pipelined
            pl.BlockSpec((Din, Dout), lambda i: (0, 0)),   # bf16 weight stays resident
            pl.BlockSpec((1, Dout), lambda i: (0, 0)),     # f32 bias stays resident
        ],
        out_specs=pl.BlockSpec((tm, Dout), lambda i: (i, 0)),
        compiler_params=_compiler_params(("parallel",)),
    )(x2d, w_bf16, b.reshape(1, Dout))


# ---------------------------------------------------------------------------
# Kernel 1b: fused QKV projection (self-attention: read x once, 3 outputs)
# ---------------------------------------------------------------------------
def _fused_qkv_kernel(x_ref, w_ref, b_ref, q_ref, k_ref, v_ref, *, d_model):
    x = x_ref[...].astype(jnp.bfloat16)
    acc = jnp.dot(x, w_ref[...], preferred_element_type=jnp.float32) + b_ref[...]
    y = acc.astype(jnp.bfloat16)                       # (tm, 3*d_model) bf16
    q_ref[...] = y[:, :d_model]
    k_ref[...] = y[:, d_model:2 * d_model]
    v_ref[...] = y[:, 2 * d_model:]


def pallas_fused_qkv(x2d, w_qkv_bf16, b_qkv, d_model):
    """x2d: (M, d_model); w_qkv: (d_model, 3*d_model) bf16 -> three (M, d_model) bf16."""
    M, Din = x2d.shape
    tm = _choose_block(M)
    kernel = functools.partial(_fused_qkv_kernel, d_model=d_model)
    return pl.pallas_call(
        kernel,
        out_shape=tuple(jax.ShapeDtypeStruct((M, d_model), jnp.bfloat16)
                        for _ in range(3)),
        grid=(M // tm,),
        in_specs=[
            pl.BlockSpec((tm, Din), lambda i: (i, 0)),
            pl.BlockSpec((Din, 3 * d_model), lambda i: (0, 0)),
            pl.BlockSpec((1, 3 * d_model), lambda i: (0, 0)),
        ],
        out_specs=[pl.BlockSpec((tm, d_model), lambda i: (i, 0))] * 3,
        compiler_params=_compiler_params(("parallel",)),
    )(x2d, w_qkv_bf16, b_qkv.reshape(1, 3 * d_model))


# ---------------------------------------------------------------------------
# Kernel 2: flash-style multi-head attention
#   grid = (B, Sq/tq, Sk/tk); q/o query-tiled, K/V streamed along the
#   'arbitrary' KV axis; per-head online softmax with m/l/acc VMEM scratch.
# ---------------------------------------------------------------------------
def _attn_kernel(q_ref, k_ref, v_ref, bias_ref, o_ref, m_sc, l_sc, acc_sc, *, h, d_k):
    kv = pl.program_id(2)
    tq = q_ref.shape[1]
    tk = k_ref.shape[1]

    @pl.when(kv == 0)
    def _init():
        m_sc[...] = jnp.full_like(m_sc, -jnp.inf)
        l_sc[...] = jnp.zeros_like(l_sc)
        acc_sc[...] = jnp.zeros_like(acc_sc)

    # Hoisted out of the per-head loop: whole-tile bf16 loads + mask-bias broadcast.
    q_all = q_ref[0]                                   # (tq, d_model) bf16 (scale folded in)
    k_all = k_ref[0]                                   # (tk, d_model) bf16
    v_all = v_ref[0]                                   # (tk, d_model) bf16
    bias_b = jnp.broadcast_to(bias_ref[0, 0], (tq, tk))  # (tq, tk) f32 additive mask

    for head in range(h):                              # static unroll over heads
        lo = head * d_k
        qh = q_all[:, lo:lo + d_k]                     # (tq, d_k) bf16
        kh = k_all[:, lo:lo + d_k]                     # (tk, d_k) bf16
        vh = v_all[:, lo:lo + d_k]                     # (tk, d_k) bf16

        # q @ k^T via dot_general contracting last axes (no explicit transpose)
        scores = lax.dot_general(qh, kh, (((1,), (1,)), ((), ())),
                                 preferred_element_type=jnp.float32)   # (tq, tk) f32
        scores = scores + bias_b                                        # masking

        # online softmax update (all f32)
        m_prev = m_sc[head]                            # (tq, 1)
        m_new = jnp.maximum(m_prev, jnp.max(scores, axis=-1, keepdims=True))
        alpha = jnp.exp(m_prev - m_new)
        p = jnp.exp(scores - m_new)
        l_sc[head] = alpha * l_sc[head] + jnp.sum(p, axis=-1, keepdims=True)
        acc_sc[head] = alpha * acc_sc[head] + jnp.dot(
            p.astype(jnp.bfloat16), vh, preferred_element_type=jnp.float32)
        m_sc[head] = m_new

    @pl.when(kv == pl.num_programs(2) - 1)
    def _finalize():
        # TODO(synk): pl.reciprocal(approx=True) + bf16 P@V gives ~1e-2 rel error;
        #             switch to approx=False if exact softmax is required.
        ctx = [acc_sc[head] * pl.reciprocal(l_sc[head], approx=True)
               for head in range(h)]
        # single lane-dense (tq, h*d_k) = (tq, d_model) bf16 store
        o_ref[0] = jnp.concatenate(ctx, axis=-1).astype(o_ref.dtype)


def pallas_attention(q, k, v, bias, h, *, tq=None, tk=None):
    """q: (B, Sq, d_model) bf16; k, v: (B, Sk, d_model) bf16; bias: (B, 1, Sk) f32."""
    B, Sq, d_model = q.shape
    Sk = k.shape[1]
    d_k = d_model // h
    if tq is None or Sq % tq != 0:
        tq = _choose_block(Sq)
    if tk is None or Sk % tk != 0:
        tk = _choose_block(Sk)
    nk = Sk // tk
    # Reshape the additive mask so each KV tile is a full-extent trailing block
    # (keeps BlockSpecs (8,128)-legal with no in-kernel dynamic lane slicing).
    bias4 = bias.reshape(B, nk, 1, tk)

    kernel = functools.partial(_attn_kernel, h=h, d_k=d_k)
    return pl.pallas_call(
        kernel,
        out_shape=jax.ShapeDtypeStruct((B, Sq, d_model), jnp.bfloat16),
        grid=(B, Sq // tq, nk),
        in_specs=[
            pl.BlockSpec((1, tq, d_model), lambda b, qi, ki: (b, qi, 0)),
            pl.BlockSpec((1, tk, d_model), lambda b, qi, ki: (b, ki, 0)),
            pl.BlockSpec((1, tk, d_model), lambda b, qi, ki: (b, ki, 0)),
            pl.BlockSpec((1, 1, 1, tk), lambda b, qi, ki: (b, ki, 0, 0)),
        ],
        out_specs=pl.BlockSpec((1, tq, d_model), lambda b, qi, ki: (b, qi, 0)),
        scratch_shapes=[
            pltpu.VMEM((h, tq, 1), jnp.float32),       # running max m
            pltpu.VMEM((h, tq, 1), jnp.float32),       # running denom l
            pltpu.VMEM((h, tq, d_k), jnp.float32),     # running numerator acc
        ],
        compiler_params=_compiler_params(("parallel", "parallel", "arbitrary")),
    )(q, k, v, bias4)


# ---------------------------------------------------------------------------
# Full module forward
# ---------------------------------------------------------------------------
def multi_headed_attention(params, query, key, value, mask, h, *, tq=None, tk=None):
    """query: (B, Sq, d_model) f32; key/value: (B, Sk, d_model) f32;
    mask: (B, 1, Sk) int (1 = keep) or None."""
    B, Sq, d_model = query.shape
    assert d_model % h == 0
    d_k = d_model // h
    scale = jnp.float32(1.0 / math.sqrt(d_k))

    # Fold 1/sqrt(d_k) into the query projection (one-time, constant-folded under
    # jit); cast weights to bf16 once; biases stay f32.
    wq = (params["wq"] * scale).astype(jnp.bfloat16)
    bq = params["bq"] * scale
    wk = params["wk"].astype(jnp.bfloat16)
    wv = params["wv"].astype(jnp.bfloat16)
    wo = params["wo"].astype(jnp.bfloat16)

    if (query is key) and (key is value):
        # Self-attention: fused QKV projection — one launch, x read from HBM once.
        w_qkv = jnp.concatenate([wq, wk, wv], axis=1)                   # (d_model, 3*d_model)
        b_qkv = jnp.concatenate([bq, params["bk"], params["bv"]])       # (3*d_model,)
        q2, k2, v2 = pallas_fused_qkv(query.reshape(B * Sq, d_model), w_qkv, b_qkv, d_model)
        Sk = Sq
    else:
        Sk = key.shape[1]
        q2 = pallas_linear(query.reshape(B * Sq, d_model), wq, bq)
        k2 = pallas_linear(key.reshape(B * Sk, d_model), wk, params["bk"])
        v2 = pallas_linear(value.reshape(B * Sk, d_model), wv, params["bv"])

    q = q2.reshape(B, Sq, d_model)                     # lane-dense bf16; head split in-kernel
    k = k2.reshape(B, Sk, d_model)
    v = v2.reshape(B, Sk, d_model)

    # additive mask bias precomputed once (torch: masked_fill(mask==0, -1e9))
    if mask is not None:
        bias = jnp.where(mask == 0, jnp.float32(-1e9), jnp.float32(0.0))
    else:
        bias = jnp.zeros((B, 1, Sk), jnp.float32)

    ctx = pallas_attention(q, k, v, bias, h, tq=tq, tk=tk)              # (B, Sq, d_model) bf16

    out = pallas_linear(ctx.reshape(B * Sq, d_model), wo, params["bo"],
                        out_dtype=jnp.float32)
    return out.reshape(B, Sq, d_model)


# ---------------------------------------------------------------------------
# Pure-JAX f32 reference (silent correctness check)
# ---------------------------------------------------------------------------
def reference(params, query, key, value, mask, h):
    B, S, d_model = query.shape
    d_k = d_model // h

    def proj(x, w, b):
        y = x @ w + b
        return y.reshape(B, S, h, d_k).transpose(0, 2, 1, 3)

    q = proj(query, params["wq"], params["bq"])
    k = proj(key, params["wk"], params["bk"])
    v = proj(value, params["wv"], params["bv"])
    scores = jnp.einsum("bhqd,bhkd->bhqk", q, k) / math.sqrt(d_k)
    scores = jnp.where(mask[:, None, :, :] == 0, -1e9, scores)
    p = jax.nn.softmax(scores, axis=-1)
    ctx = jnp.einsum("bhqk,bhkd->bhqd", p, v)
    ctx = ctx.transpose(0, 2, 1, 3).reshape(B, S, d_model)
    return ctx @ params["wo"] + params["bo"]


if __name__ == "__main__":
    B, S, d_model, h = 2, 16, 32, 4

    key0 = jax.random.PRNGKey(0)
    ks = jax.random.split(key0, 12)
    bound = 1.0 / math.sqrt(d_model)  # nn.Linear default init range

    params = {
        "wq": jax.random.uniform(ks[0], (d_model, d_model), jnp.float32, -bound, bound),
        "bq": jax.random.uniform(ks[1], (d_model,), jnp.float32, -bound, bound),
        "wk": jax.random.uniform(ks[2], (d_model, d_model), jnp.float32, -bound, bound),
        "bk": jax.random.uniform(ks[3], (d_model,), jnp.float32, -bound, bound),
        "wv": jax.random.uniform(ks[4], (d_model, d_model), jnp.float32, -bound, bound),
        "bv": jax.random.uniform(ks[5], (d_model,), jnp.float32, -bound, bound),
        "wo": jax.random.uniform(ks[6], (d_model, d_model), jnp.float32, -bound, bound),
        "bo": jax.random.uniform(ks[7], (d_model,), jnp.float32, -bound, bound),
    }

    query = jax.random.normal(ks[8], (B, S, d_model), jnp.float32)
    key_in = jax.random.normal(ks[9], (B, S, d_model), jnp.float32)
    value = jax.random.normal(ks[10], (B, S, d_model), jnp.float32)
    # padding mask: last 3 key positions of batch 1 masked out (1 = keep, 0 = mask)
    mask = jnp.ones((B, 1, S), jnp.int32).at[1, 0, S - 3:].set(0)

    # Case 1: distinct q/k/v inputs (separate projections); tq=tk=8 forces a
    # multi-step flash-KV / query-tile grid at these tiny shapes.
    out = multi_headed_attention(params, query, key_in, value, mask, h, tq=8, tk=8)
    out = jax.block_until_ready(out)
    ref = reference(params, query, key_in, value, mask, h)
    assert out.shape == (B, S, d_model)
    # tolerance accounts for bf16 activations/MXU operands + approx reciprocal
    assert jnp.allclose(out, ref, atol=2e-2, rtol=2e-2), "cross-attention mismatch"

    # Case 2: self-attention (query is key is value) exercises the fused-QKV path.
    out2 = multi_headed_attention(params, query, query, query, mask, h)
    out2 = jax.block_until_ready(out2)
    ref2 = reference(params, query, query, query, mask, h)
    assert jnp.allclose(out2, ref2, atol=2e-2, rtol=2e-2), "self-attention mismatch"

    print("KERNEL_OK")
</pallas_src>

<mosaic_0001>
module attributes {stable_mosaic.version = 11 : i64} {
  func.func @_linear_kernel(%arg0: i32, %arg1: memref<32x32xf32, #tpu.memory_space<vmem>>, %arg2: memref<32x32xbf16, #tpu.memory_space<vmem>>, %arg3: memref<1x32xf32, #tpu.memory_space<vmem>>, %arg4: memref<32x32xbf16, #tpu.memory_space<vmem>>) attributes {dimension_semantics = [#tpu.dimension_semantics<parallel>], iteration_bounds = array<i64: 1>, scalar_prefetch = 0 : i64, scratch_operands = 0 : i64, tpu.core_type = #tpu.core_type<tc>, window_params = [{transform_indices = @transform_0, window_bounds = array<i64: 32, 32>}, {pipeline_mode = #tpu.pipeline_mode<synchronous>, transform_indices = @transform_1, window_bounds = array<i64: 32, 32>}, {pipeline_mode = #tpu.pipeline_mode<synchronous>, transform_indices = @transform_2, window_bounds = array<i64: 1, 32>}, {transform_indices = @transform_3, window_bounds = array<i64: 32, 32>}]} {
    %c0 = arith.constant 0 : index
    %c0_0 = arith.constant 0 : index
    %0 = vector.load %arg1[%c0, %c0_0] : memref<32x32xf32, #tpu.memory_space<vmem>>, vector<32x32xf32>
    %1 = arith.truncf %0 : vector<32x32xf32> to vector<32x32xbf16>
    %c0_1 = arith.constant 0 : index
    %c0_2 = arith.constant 0 : index
    %2 = vector.load %arg2[%c0_1, %c0_2] : memref<32x32xbf16, #tpu.memory_space<vmem>>, vector<32x32xbf16>
    %cst = arith.constant dense<0.000000e+00> : vector<32x32xf32>
    %3 = tpu.matmul %1, %2, %cst {dimension_numbers = #tpu.dot_dimension_numbers<[1], [0], [0], [1], [0, 0, 1, 1], [], []>} : vector<32x32xbf16>, vector<32x32xbf16>, vector<32x32xf32> -> vector<32x32xf32>
    %c0_3 = arith.constant 0 : index
    %c0_4 = arith.constant 0 : index
    %4 = vector.load %arg3[%c0_3, %c0_4] : memref<1x32xf32, #tpu.memory_space<vmem>>, vector<1x32xf32>
    %5 = vector.broadcast %4 : vector<1x32xf32> to vector<32x32xf32>
    %6 = arith.addf %3, %5 : vector<32x32xf32>
    %7 = arith.truncf %6 : vector<32x32xf32> to vector<32x32xbf16>
    %c0_5 = arith.constant 0 : index
    %c0_6 = arith.constant 0 : index
    %8 = vector.load %arg4[%c0_5, %c0_6] : memref<32x32xbf16, #tpu.memory_space<vmem>>, vector<32x32xbf16>
    tpu.vector_store %arg4[%c0_5, %c0_6], %7 {strides = array<i32>} : memref<32x32xbf16, #tpu.memory_space<vmem>>, vector<32x32xbf16>,
    return
  }
  func.func @transform_0(%arg0: i32) -> (i32, i32) {
    %c0_i32 = arith.constant 0 : i32
    %c0_i32_0 = arith.constant 0 : i32
    return %arg0, %c0_i32 : i32, i32
  }
  func.func @transform_1(%arg0: i32) -> (i32, i32) {
    %c0_i32 = arith.constant 0 : i32
    %c0_i32_0 = arith.constant 0 : i32
    %c0_i32_1 = arith.constant 0 : i32
    return %c0_i32, %c0_i32_0 : i32, i32
  }
  func.func @transform_2(%arg0: i32) -> (i32, i32) {
    %c0_i32 = arith.constant 0 : i32
    %c0_i32_0 = arith.constant 0 : i32
    %c0_i32_1 = arith.constant 0 : i32
    return %c0_i32, %c0_i32_0 : i32, i32
  }
  func.func @transform_3(%arg0: i32) -> (i32, i32) {
    %c0_i32 = arith.constant 0 : i32
    %c0_i32_0 = arith.constant 0 : i32
    return %arg0, %c0_i32 : i32, i32
  }
}

</mosaic_0001>

<bundles_post_ra>
// kernel: tpu_custom_call.1
= control target key start
LH: loop header
LB: loop body
LE: loop exit
PB: predicated region body
PF: predicated region fallthrough
CT: control target
= control target key end

     0   :  { %8 = vsyncpa [#allocation3], 0  ;;  %s278_s0 = inlined_call_operand.hbm [shape: f32[32,32], index: 0, kind: input, shape index: {}]   ;;  %s279_s1 = inlined_call_operand.hbm [shape: bf16[32,32], index: 1, kind: input, shape index: {}]   ;;  %s280_s2 = inlined_call_operand.vmem [shape: f32[1,32], index: 2, kind: input, shape index: {}]   ;;  %s281_s3 = inlined_call_operand.hbm [shape: bf16[32,32], index: 3, kind: output, shape index: {}]  }
   0x1   :  { %9 = vsyncpa [#allocation6], 0 }
   0x2   :  { %10 = vsyncpa [#allocation4], 0  ;;  %s15_s14 = sshll.u32 %s278_s0, 4  ;;  %s229_s15 = smov [#allocation2]   ;;  %s16_s14 = int_to_ptr.hbm [resolvable:$true] %s15_s14 }
   0x3   :  { %s17_s16 = sshll.u32 %s229_s15, 4  ;;  %s28_s19 = sshll.u32 %s279_s1, 4  ;;  %s18_s16 = int_to_ptr.vmem [resolvable:$true] %s17_s16  ;;  %s29_s19 = int_to_ptr.hbm [resolvable:$true] %s28_s19 }
   0x4   :  { %s230_s20 = smov 128   ;;  %s231_s21 = smov 8  }
   0x5   :  { %23 = dma.hbm_to_vmem [thread:$0]  %s16_s14, 512, %s18_s16, [#allocation3], %s230_s20, %s230_s20, %s231_s21  }
   0x6   :  { %s232_s22 = smov [#allocation5]   ;;  %s233_s24 = smov 64  }
   0x7   :  { %s30_s23 = sshll.u32 %s232_s22, 4  ;;  %s234_s25 = smov 4   ;;  %s31_s23 = int_to_ptr.vmem [resolvable:$true] %s30_s23 }
   0x8   :  { %36 = dma.hbm_to_vmem [thread:$0]  %s29_s19, 256, %s31_s23, [#allocation6], %s233_s24, %s233_s24, %s234_s25  }
   0x9   :  { %223 = dma.done.wait [#allocation3], 512  }
   0xa   :  { %224 = vsyncadd [#allocation3], 4294966784 }
   0xb   :  { %225 = dma.done.wait [#allocation6], 256  }
   0xc   :  { %226 = vsyncadd [#allocation6], 4294967040  ;;  %v140_v0 = vld [vmem:[#allocation5 + $0x8] sm:$0xff]  ;;  %v139_v1 = vld [vmem:[#allocation5] sm:$0xff]  ;;  %vm74_vm0 = vcmask 261120   ;;  %vm104_vm1 = vcmask 257024  }
   0xd   :  { %v48_v2 = vld [vmem:[#allocation2] sm:$0xff]  ;;  %v49_v3 = vld [vmem:[#allocation2 + $0x8] sm:$0xff]  ;;  %87 = vmatpush.bf16.msra.mxu0 %v140_v0  ;;  %141 = vmatpush.bf16.msra.mxu1 %v140_v0  ;;  %v50_v4 = vld [vmem:[#allocation2 + $0x10] sm:$0xff]  ;;  %s235_s26 = smov [#allocation7]  }
   0xe   :  { %v51_v5 = vld [vmem:[#allocation2 + $0x18] sm:$0xff]  ;;  %v52_v6 = vpack.c.bf16 %v49_v3, %v48_v2  ;;  %v150_v8 = vld [vmem:[%s280_s2] ss:$0 sm:$0xff]  ;;  %s113_s27 = sshll.u32 %s235_s26, 4  ;;  %s115_s2 = sshll.u32 %s281_s3, 4  ;;  %s114_s27 = int_to_ptr.vmem [resolvable:$true] %s113_s27  ;;  %s116_s2 = int_to_ptr.hbm [resolvable:$true] %s115_s2 }
   0xf   :  { %v53_v7 = vpack.c.bf16 %v51_v5, %v50_v4 }
  0x11   :  { %88 = vmatpush.bf16.msra.mxu0 %v139_v1  ;;  %142 = vmatpush.bf16.msra.mxu1 %v139_v1 }
  0x14   :  { %137 = vmatmul.msk.bf16.vlgmr.msra.gmra.mxu0 %vm74_vm0, %v52_v6  ;;  %138 = vmatmul.msk.bf16.vlgmr.msra.gmra.mxu1 %vm74_vm0, %v53_v7 }
  0x91   :  { %v90_v9 = vpop.f32.mrf.mxu0  ;;  %v95_v10 = vpop.f32.mrf.mxu1 }
  0x92   :  { %v91_v11 = vadd.f32 %v150_v8, %v90_v9  ;;  %v96_v12 = vadd.f32 %v150_v8, %v95_v10 }
  0x94   :  { %v100_v13 = vpack.c.bf16 %v91_v11, %v91_v11  ;;  %v102_v14 = vpack.c.bf16 %v96_v12, %v96_v12 }
  0x96   :  { %105 = vst.msk [vmem:[#allocation7] sm:$0xf] %vm104_vm1, %v100_v13 }
  0x97   :  { %107 = vst.msk [vmem:[#allocation7 + $0x8] sm:$0xf] %vm104_vm1, %v102_v14 }
  0x99   :  { %v92_v15 = vpop.f32.mrf.mxu0  ;;  %v97_v16 = vpop.f32.mrf.mxu1 }
  0x9a   :  { %v93_v17 = vadd.f32 %v150_v8, %v92_v15  ;;  %v98_v18 = vadd.f32 %v150_v8, %v97_v16 }
  0x9c   :  { %v101_v19 = vpack.c.bf16 %v93_v17, %v93_v17  ;;  %v103_v20 = vpack.c.bf16 %v98_v18, %v98_v18 }
  0x9e   :  { %106 = vst.msk [vmem:[#allocation7 + $0x4] sm:$0xf] %vm104_vm1, %v101_v19 }
  0x9f   :  { %108 = vst.msk [vmem:[#allocation7 + $0xc] sm:$0xf] %vm104_vm1, %v103_v20 }
  0xa0   :  { %121 = dma.vmem_to_hbm [thread:$0]  %s114_s27, 256, %s116_s2, [#allocation4], %s233_s24, %s233_s24, %s234_s25  }
  0xa1   :  { %227 = dma.done.wait [#allocation4], 256  }
  0xa2   :  { %228 = vsyncadd [#allocation4], 4294967040 }
  0xa3   :  { %126 = vsyncpa [#allocation3], 1 }
  0xa4   :  { %127 = vsyncpa [#allocation6], 1 }
  0xa5   :  { %128 = vsyncpa [#allocation4], 1 }

</bundles_post_ra>
